<compile_context>
chip_gen: v7x
topology: tpu7x:2x2x1
jax: 0.10.0
libtpu: 0.0.40
codegen_flags: <defaults>
</compile_context>

<pallas_src>
import functools

import jax
import jax.numpy as jnp
from jax import lax
from jax.experimental import pallas as pl
from jax.experimental.pallas import tpu as pltpu


_HIGHEST = lax.Precision.HIGHEST


def _round_up(n, m):
    return ((n + m - 1) // m) * m


def _cdiv(a, b):
    return (a + b - 1) // b


def _vmem_capacity_bytes(default=64 * 1024 * 1024):
    """Physical VMEM per TensorCore; falls back to the smallest (v7x) value."""
    try:
        return int(pltpu.get_tpu_info().vmem_capacity_bytes)
    except Exception:
        return default


def mlp_kernel(x_ref, w1_ref, b1_ref, w2_ref, b2_ref, w3_ref, b3_ref, o_ref,
               *, chunk):
    # x_ref: (TB, 8) batch-major block of the input.
    # w*_ref: (out, in) PyTorch nn.Linear layout; b*_ref: (out, 1).
    # o_ref: (TB, 2) batch-major block of the output.
    tb = x_ref.shape[0]
    c = min(chunk, tb)
    n_full, rem = divmod(tb, c)

    # Weights are tiny and VMEM-resident (constant index_map); load once per tile.
    w1 = w1_ref[...]
    b1 = b1_ref[...]
    w2 = w2_ref[...]
    b2 = b2_ref[...]
    w3 = w3_ref[...]
    b3 = b3_ref[...]

    def do_chunk(start, width):
        # Lane-dense orientation: batch on the 128-lane axis.  The (width, 8)
        # slice is consumed transposed by the first matmul (fused into the MXU
        # op), so activations are (20, width)/(2, width) and every VPU op is
        # full-width.
        xc = x_ref[pl.ds(start, width), :]                       # (width, 8)
        h1 = jnp.dot(w1, xc.T, precision=_HIGHEST,
                     preferred_element_type=jnp.float32)
        h1 = jnp.maximum(h1 + b1, 0.0)                           # (20, width)
        h2 = jnp.dot(w2, h1, precision=_HIGHEST,
                     preferred_element_type=jnp.float32)
        h2 = jnp.maximum(h2 + b2, 0.0)                           # (20, width)
        out = jnp.dot(w3, h2, precision=_HIGHEST,
                      preferred_element_type=jnp.float32) + b3   # (2, width)
        # Transpose the tiny result in-kernel (XLU; non-binding slot) so the
        # output stays in the PyTorch (batch, 2) layout with no wrapper pass.
        o_ref[pl.ds(start, width), :] = out.T.astype(o_ref.dtype)

    if n_full > 0:
        def body(i, carry):
            do_chunk(pl.multiple_of(i * c, c), c)
            return carry
        lax.fori_loop(0, n_full, body, 0, unroll=True)
    if rem:
        do_chunk(n_full * c, rem)


def ann_model_forward(x, params, *, tb=32768, chunk=1024):
    """x: (B, input_features) float32, native PyTorch layout.

    Returns (B, out_features) float32, matching ANN_Model.forward.
    """
    w1, b1, w2, b2, w3, b3 = (params["w1"], params["b1"], params["w2"],
                              params["b2"], params["w3"], params["b3"])
    B, F = x.shape
    out_features = w3.shape[0]

    # Pad only to the 8-sublane alignment (no-op when already aligned) — NOT
    # to TB, so there is no large pad materialization.
    B_pad = _round_up(B, 8)
    if B_pad != B:
        x = jnp.pad(x, ((0, B_pad - B), (0, 0)))

    # --- Batch-tile sizing --------------------------------------------------
    # Per in-flight row the pipeline holds lane-padded (TB, 8) + (TB, 2) f32
    # blocks, double-buffered: ~2 KiB/row of VMEM.  Cap TB so the I/O buffers
    # use <= ~40% of this generation's VMEM (v5e/v6e 128 MiB -> ~25K rows,
    # v7x 64 MiB -> ~12K rows), and keep >= 2 grid steps when the batch allows
    # it so the "parallel" axis can use both v7x TensorCores.
    lane_row_bytes = 128 * 4                       # one f32 row padded to 128 lanes
    io_bytes_per_row = 2 * 2 * lane_row_bytes      # (x + out) blocks, double-buffered
    vmem_cap = _vmem_capacity_bytes()
    tb_cap = max(chunk,
                 (int(0.4 * vmem_cap) // io_bytes_per_row) // chunk * chunk)
    TB = min(_round_up(tb, chunk), tb_cap)
    if B_pad >= 2 * chunk:
        TB = min(TB, _round_up(_cdiv(B_pad, 2), chunk))
    TB = min(TB, B_pad)

    num_tiles = _cdiv(B_pad, TB)   # ragged last tile is masked by Pallas

    # Weights/biases: full-array blocks with constant index_map -> fetched once
    # and kept VMEM-resident across the whole batch grid.
    # (They could additionally use pipeline_mode=pl.Buffered(1); left at the
    #  default double-buffer — it only costs ~100 KiB.)
    resident = lambda shape: pl.BlockSpec(shape, lambda i: (0,) * len(shape))

    kernel = functools.partial(mlp_kernel, chunk=chunk)

    out = pl.pallas_call(
        kernel,
        out_shape=jax.ShapeDtypeStruct((B_pad, out_features), jnp.float32),
        grid_spec=pl.GridSpec(
            grid=(num_tiles,),
            in_specs=[
                pl.BlockSpec((TB, F), lambda i: (i, 0)),   # x: tiled over batch
                resident(w1.shape), resident(b1.shape),
                resident(w2.shape), resident(b2.shape),
                resident(w3.shape), resident(b3.shape),
            ],
            out_specs=pl.BlockSpec((TB, out_features), lambda i: (i, 0)),
        ),
        compiler_params=pltpu.CompilerParams(
            dimension_semantics=("parallel",),
            vmem_limit_bytes=min(io_bytes_per_row * TB + (12 << 20),
                                 int(0.85 * vmem_cap)),
        ),
    )(x, w1, b1, w2, b2, w3, b3)

    return out if B_pad == B else out[:B]


def init_params(key, input_features=8, hidden1=20, hidden2=20, out_features=2):
    """Deterministic init mimicking PyTorch nn.Linear (uniform +-1/sqrt(fan_in)).
    Weights stored PyTorch-style as (out, in); biases as (out, 1)."""
    ks = jax.random.split(key, 6)

    def linear(kw, kb, fan_in, fan_out):
        bound = 1.0 / jnp.sqrt(float(fan_in))
        w = jax.random.uniform(kw, (fan_out, fan_in), jnp.float32, -bound, bound)
        b = jax.random.uniform(kb, (fan_out, 1), jnp.float32, -bound, bound)
        return w, b

    w1, b1 = linear(ks[0], ks[1], input_features, hidden1)
    w2, b2 = linear(ks[2], ks[3], hidden1, hidden2)
    w3, b3 = linear(ks[4], ks[5], hidden2, out_features)
    return {"w1": w1, "b1": b1, "w2": w2, "b2": b2, "w3": w3, "b3": b3}


def reference_forward(x, params):
    dot = lambda a, b: jnp.dot(a, b, precision=_HIGHEST,
                               preferred_element_type=jnp.float32)
    h1 = jnp.maximum(dot(x, params["w1"].T) + params["b1"].T, 0.0)
    h2 = jnp.maximum(dot(h1, params["w2"].T) + params["b2"].T, 0.0)
    return dot(h2, params["w3"].T) + params["b3"].T


if __name__ == "__main__":
    key = jax.random.PRNGKey(0)
    k_param, k_x = jax.random.split(key)

    input_features = 8
    params = init_params(k_param, input_features=input_features,
                         hidden1=20, hidden2=20, out_features=2)

    # batch=4: primary small case (pads 4 -> 8 rows).
    # batch=1000: unaligned batch, single tile, odd chunk width.
    # batch=5000: multi-chunk inner loop, >=2 grid steps, ragged last tile.
    for batch in (4, 1000, 5000):
        kx = jax.random.fold_in(k_x, batch)
        x = jax.random.normal(kx, (batch, input_features), jnp.float32)

        out = jax.block_until_ready(ann_model_forward(x, params))
        ref = reference_forward(x, params)

        assert out.shape == (batch, 2), out.shape
        assert jnp.allclose(out, ref, atol=1e-5, rtol=1e-5), (
            f"mismatch at batch={batch}: "
            f"max abs err {jnp.max(jnp.abs(out - ref))}")

    print("KERNEL_OK")
</pallas_src>

<mosaic_0001>
module attributes {stable_mosaic.version = 11 : i64} {
  func.func @mlp_kernel(%arg0: i32, %arg1: memref<8x8xf32, #tpu.memory_space<vmem>>, %arg2: memref<20x8xf32, #tpu.memory_space<vmem>>, %arg3: memref<20x1xf32, #tpu.memory_space<vmem>>, %arg4: memref<20x20xf32, #tpu.memory_space<vmem>>, %arg5: memref<20x1xf32, #tpu.memory_space<vmem>>, %arg6: memref<2x20xf32, #tpu.memory_space<vmem>>, %arg7: memref<2x1xf32, #tpu.memory_space<vmem>>, %arg8: memref<8x2xf32, #tpu.memory_space<vmem>>) attributes {dimension_semantics = [#tpu.dimension_semantics<parallel>], iteration_bounds = array<i64: 1>, scalar_prefetch = 0 : i64, scratch_operands = 0 : i64, tpu.core_type = #tpu.core_type<tc>, window_params = [{transform_indices = @transform_0, window_bounds = array<i64: 8, 8>}, {pipeline_mode = #tpu.pipeline_mode<synchronous>, transform_indices = @transform_1, window_bounds = array<i64: 20, 8>}, {pipeline_mode = #tpu.pipeline_mode<synchronous>, transform_indices = @transform_2, window_bounds = array<i64: 20, 1>}, {pipeline_mode = #tpu.pipeline_mode<synchronous>, transform_indices = @transform_3, window_bounds = array<i64: 20, 20>}, {pipeline_mode = #tpu.pipeline_mode<synchronous>, transform_indices = @transform_4, window_bounds = array<i64: 20, 1>}, {pipeline_mode = #tpu.pipeline_mode<synchronous>, transform_indices = @transform_5, window_bounds = array<i64: 2, 20>}, {pipeline_mode = #tpu.pipeline_mode<synchronous>, transform_indices = @transform_6, window_bounds = array<i64: 2, 1>}, {transform_indices = @transform_7, window_bounds = array<i64: 8, 2>}]} {
    %c0 = arith.constant 0 : index
    %c0_0 = arith.constant 0 : index
    %0 = vector.load %arg2[%c0, %c0_0] : memref<20x8xf32, #tpu.memory_space<vmem>>, vector<20x8xf32>
    %c0_1 = arith.constant 0 : index
    %c0_2 = arith.constant 0 : index
    %1 = vector.load %arg3[%c0_1, %c0_2] : memref<20x1xf32, #tpu.memory_space<vmem>>, vector<20x1xf32>
    %c0_3 = arith.constant 0 : index
    %c0_4 = arith.constant 0 : index
    %2 = vector.load %arg4[%c0_3, %c0_4] : memref<20x20xf32, #tpu.memory_space<vmem>>, vector<20x20xf32>
    %c0_5 = arith.constant 0 : index
    %c0_6 = arith.constant 0 : index
    %3 = vector.load %arg5[%c0_5, %c0_6] : memref<20x1xf32, #tpu.memory_space<vmem>>, vector<20x1xf32>
    %c0_7 = arith.constant 0 : index
    %c0_8 = arith.constant 0 : index
    %4 = vector.load %arg6[%c0_7, %c0_8] : memref<2x20xf32, #tpu.memory_space<vmem>>, vector<2x20xf32>
    %c0_9 = arith.constant 0 : index
    %c0_10 = arith.constant 0 : index
    %5 = vector.load %arg7[%c0_9, %c0_10] : memref<2x1xf32, #tpu.memory_space<vmem>>, vector<2x1xf32>
    %c0_i32 = arith.constant 0 : i32
    %c8_i32 = arith.constant 8 : i32
    %6 = arith.muli %c0_i32, %c8_i32 : i32
    %7 = tpu.assume_multiple %6, 8 : i32
    %8 = arith.index_cast %7 : i32 to index
    %c0_11 = arith.constant 0 : index
    %9 = vector.load %arg1[%8, %c0_11] : memref<8x8xf32, #tpu.memory_space<vmem>>, vector<8x8xf32>
    %10 = tpu.transpose %9, [1, 0] : vector<8x8xf32> -> vector<8x8xf32>
    %cst = arith.constant dense<0.000000e+00> : vector<20x8xf32>
    %11 = tpu.matmul %0, %10, %cst {dimension_numbers = #tpu.dot_dimension_numbers<[1], [0], [0], [1], [0, 0, 1, 1], [], []>, precision = #tpu.contract_precision<fp32>} : vector<20x8xf32>, vector<8x8xf32>, vector<20x8xf32> -> vector<20x8xf32>
    %12 = vector.broadcast %1 : vector<20x1xf32> to vector<20x8xf32>
    %13 = arith.addf %11, %12 : vector<20x8xf32>
    %cst_12 = arith.constant 0.000000e+00 : f32
    %14 = vector.broadcast %cst_12 : f32 to vector<20x8xf32>
    %15 = arith.maximumf %13, %14 : vector<20x8xf32>
    %cst_13 = arith.constant dense<0.000000e+00> : vector<20x8xf32>
    %16 = tpu.matmul %2, %15, %cst_13 {dimension_numbers = #tpu.dot_dimension_numbers<[1], [0], [0], [1], [0, 0, 1, 1], [], []>, precision = #tpu.contract_precision<fp32>} : vector<20x20xf32>, vector<20x8xf32>, vector<20x8xf32> -> vector<20x8xf32>
    %17 = vector.broadcast %3 : vector<20x1xf32> to vector<20x8xf32>
    %18 = arith.addf %16, %17 : vector<20x8xf32>
    %cst_14 = arith.constant 0.000000e+00 : f32
    %19 = vector.broadcast %cst_14 : f32 to vector<20x8xf32>
    %20 = arith.maximumf %18, %19 : vector<20x8xf32>
    %cst_15 = arith.constant dense<0.000000e+00> : vector<2x8xf32>
    %21 = tpu.matmul %4, %20, %cst_15 {dimension_numbers = #tpu.dot_dimension_numbers<[1], [0], [0], [1], [0, 0, 1, 1], [], []>, precision = #tpu.contract_precision<fp32>} : vector<2x20xf32>, vector<20x8xf32>, vector<2x8xf32> -> vector<2x8xf32>
    %22 = vector.broadcast %5 : vector<2x1xf32> to vector<2x8xf32>
    %23 = arith.addf %21, %22 : vector<2x8xf32>
    %24 = tpu.transpose %23, [1, 0] : vector<2x8xf32> -> vector<8x2xf32>
    %25 = arith.index_cast %7 : i32 to index
    %c0_16 = arith.constant 0 : index
    %26 = vector.load %arg8[%25, %c0_16] : memref<8x2xf32, #tpu.memory_space<vmem>>, vector<8x2xf32>
    tpu.vector_store %arg8[%25, %c0_16], %24 {strides = array<i32>} : memref<8x2xf32, #tpu.memory_space<vmem>>, vector<8x2xf32>,
    %c1_i32 = arith.constant 1 : i32
    return
  }
  func.func @transform_0(%arg0: i32) -> (i32, i32) {
    %c0_i32 = arith.constant 0 : i32
    %c0_i32_0 = arith.constant 0 : i32
    return %arg0, %c0_i32 : i32, i32
  }
  func.func @transform_1(%arg0: i32) -> (i32, i32) {
    %c0_i32 = arith.constant 0 : i32
    %c0_i32_0 = arith.constant 0 : i32
    %c0_i32_1 = arith.constant 0 : i32
    return %c0_i32, %c0_i32_0 : i32, i32
  }
  func.func @transform_2(%arg0: i32) -> (i32, i32) {
    %c0_i32 = arith.constant 0 : i32
    %c0_i32_0 = arith.constant 0 : i32
    %c0_i32_1 = arith.constant 0 : i32
    return %c0_i32, %c0_i32_0 : i32, i32
  }
  func.func @transform_3(%arg0: i32) -> (i32, i32) {
    %c0_i32 = arith.constant 0 : i32
    %c0_i32_0 = arith.constant 0 : i32
    %c0_i32_1 = arith.constant 0 : i32
    return %c0_i32, %c0_i32_0 : i32, i32
  }
  func.func @transform_4(%arg0: i32) -> (i32, i32) {
    %c0_i32 = arith.constant 0 : i32
    %c0_i32_0 = arith.constant 0 : i32
    %c0_i32_1 = arith.constant 0 : i32
    return %c0_i32, %c0_i32_0 : i32, i32
  }
  func.func @transform_5(%arg0: i32) -> (i32, i32) {
    %c0_i32 = arith.constant 0 : i32
    %c0_i32_0 = arith.constant 0 : i32
    %c0_i32_1 = arith.constant 0 : i32
    return %c0_i32, %c0_i32_0 : i32, i32
  }
  func.func @transform_6(%arg0: i32) -> (i32, i32) {
    %c0_i32 = arith.constant 0 : i32
    %c0_i32_0 = arith.constant 0 : i32
    %c0_i32_1 = arith.constant 0 : i32
    return %c0_i32, %c0_i32_0 : i32, i32
  }
  func.func @transform_7(%arg0: i32) -> (i32, i32) {
    %c0_i32 = arith.constant 0 : i32
    %c0_i32_0 = arith.constant 0 : i32
    return %arg0, %c0_i32 : i32, i32
  }
}

</mosaic_0001>

<bundles_post_ra>
// kernel: tpu_custom_call.1
= control target key start
LH: loop header
LB: loop body
LE: loop exit
PB: predicated region body
PF: predicated region fallthrough
CT: control target
= control target key end

     0   :  { %vm56_vm0 = vcmask 64512   ;;  %v2124_v0 = vmov 0.0   ;;  %vm2125_vm1 = vmmov 0   ;;  %v2126_v11 = vmov 0   ;;  %s2418_s0 = inlined_call_operand.vmem [shape: f32[8,8], index: 0, kind: input, shape index: {}]   ;;  %s2419_s1 = inlined_call_operand.vmem [shape: f32[20,8], index: 1, kind: input, shape index: {}]   ;;  %s2420_s2 = inlined_call_operand.vmem [shape: f32[20,1], index: 2, kind: input, shape index: {}]   ;;  %s2421_s4 = inlined_call_operand.vmem [shape: f32[20,1], index: 4, kind: input, shape index: {}]   ;;  %s2422_s6 = inlined_call_operand.vmem [shape: f32[2,1], index: 6, kind: input, shape index: {}]   ;;  %s2423_s3 = inlined_call_operand.vmem [shape: f32[20,20], index: 3, kind: input, shape index: {}]   ;;  %s2424_s5 = inlined_call_operand.vmem [shape: f32[2,20], index: 5, kind: input, shape index: {}]   ;;  %s2425_s7 = inlined_call_operand.vmem [shape: f32[8,2], index: 7, kind: output, shape index: {}]  }
   0x1   :  { %1810 = vmatprep.subr.mxu0 %v2124_v0  ;;  %v40_v1 = vld [vmem:[%s2418_s0] sm:$0xff]  ;;  %1812 = vmatprep.mubr.msk.f32.mxu0 %vm2125_vm1, %v2124_v0  ;;  %v27_v3 = vld [vmem:[%s2419_s1 + $0x8] sm:$0xff]  ;;  %v28_v7 = vld [vmem:[%s2419_s1 + $0x10] sm:$0xf]  ;;  %v2127_v37 = vmov 0.0|0.0   ;;  %vm619_vm2 = vcmask 162816  }
   0x2   :  { %v26_v2 = vld [vmem:[%s2419_s1] sm:$0xff]  ;;  %v67_v4 = vsel %vm56_vm0, %v40_v1, 0  ;;  %v61_v6 = vsel %vm56_vm0, %v27_v3, 0  ;;  %1799 = vmatprep.subr.mxu1 %v2124_v0  ;;  %1801 = vmatprep.mubr.msk.f32.mxu1 %vm2125_vm1, %v2124_v0  ;;  %v31_v13 = vld [vmem:[%s2420_s2 + $0x10] sm:$0xf]  ;;  %v64_v16 = vsel %vm56_vm0, %v28_v7, 0 }
   0x3   :  { %v58_v5 = vsel %vm56_vm0, %v26_v2, 0  ;;  %v29_v8 = vld [vmem:[%s2420_s2] sm:$0xff]  ;;  %v2192_v9 = vand.u32 4294901760, %v67_v4  ;;  %2122 = vset.pattern.permute.xlu0 %v2126_v11  ;;  %2123 = vset.pattern.permute.xlu1 %v2126_v11  ;;  %v2196_v12 = vand.u32 4294901760, %v61_v6  ;;  %v30_v17 = vld [vmem:[%s2420_s2 + $0x8] sm:$0xff]  ;;  %v2212_v22 = vand.u32 4294901760, %v64_v16 }
   0x4   :  { %v2194_v10 = vand.u32 4294901760, %v58_v5  ;;  %43 = vperm.xlu0 %2122, %v29_v8   ;;  %53 = vperm.xlu1 %2123, %v31_v13   ;;  %v35_v19 = vld [vmem:[%s2421_s4] sm:$0xff]  ;;  %v36_v26 = vld [vmem:[%s2421_s4 + $0x8] sm:$0xff]  ;;  %v37_v32 = vld [vmem:[%s2421_s4 + $0x10] sm:$0xf]  ;;  %vm629_vm3 = vcmask 1043456  }
   0x5   :  { %v167_v14 = vsub.f32 %v67_v4, %v2192_v9  ;;  %1800 = vmatpush3.xpose.msra.mxu1 %v2192_v9  ;;  %v146_v18 = vsub.f32 %v61_v6, %v2196_v12  ;;  %v156_v27 = vsub.f32 %v64_v16, %v2212_v22  ;;  %v39_v33 = vld [vmem:[%s2422_s6] sm:$0x3]  ;;  %v33_v47 = vld [vmem:[%s2423_s3 + $0x8] sm:$0xff]  ;;  %v34_v52 = vld [vmem:[%s2423_s3 + $0x10] sm:$0xf]  ;;  %vm1709_vm4 = vcmask 15360  }
   0x6   :  { %v136_v15 = vsub.f32 %v58_v5, %v2194_v10  ;;  %2009 = vmatprep.subr.bf16.mxu1 %v2127_v37  ;;  %v32_v44 = vld [vmem:[%s2423_s3] sm:$0xff]  ;;  %v624_v50 = vsel %vm619_vm2, %v33_v47, 0  ;;  %v627_v60 = vsel %vm619_vm2, %v34_v52, 0 }
   0x7   :  { %v168_v20 = vand.u32 4294901760, %v167_v14  ;;  %v147_v23 = vand.u32 4294901760, %v146_v18  ;;  %v157_v31 = vand.u32 4294901760, %v156_v27  ;;  %v621_v45 = vsel %vm619_vm2, %v32_v44, 0 }
   0x8   :  { %v137_v21 = vand.u32 4294901760, %v136_v15  ;;  %48 = vperm.xlu0 %2122, %v30_v17   ;;  %606 = vperm.xlu1 %2123, %v35_v19   ;;  %v2284_v49 = vand.u32 4294901760, %v621_v45  ;;  %v2293_v57 = vand.u32 4294901760, %v624_v50  ;;  %v2300_v6 = vand.u32 4294901760, %v627_v60 }
   0x9   :  { %v169_v24 = vsub.f32 %v167_v14, %v168_v20  ;;  %v148_v28 = vsub.f32 %v146_v18, %v147_v23  ;;  %v158_v35 = vsub.f32 %v156_v27, %v157_v31 }
   0xa   :  { %v138_v25 = vsub.f32 %v136_v15, %v137_v21  ;;  %v2291_v56 = vsub.f32 %v621_v45, %v2284_v49  ;;  %v2298_v5 = vsub.f32 %v624_v50, %v2293_v57  ;;  %v2307_v16 = vsub.f32 %v627_v60, %v2300_v6 }
   0xb   :  { %v170_v29 = vand.u32 4294901760, %v169_v24  ;;  %v149_v34 = vand.u32 4294901760, %v148_v28  ;;  %v159_v36 = vand.u32 4294901760, %v158_v35 }
   0xc   :  { %v139_v30 = vand.u32 4294901760, %v138_v25  ;;  %611 = vperm.xlu0 %2122, %v36_v26   ;;  %616 = vperm.xlu1 %2123, %v37_v32   ;;  %v703_v4 = vand.u32 4294901760, %v2291_v56 }
   0xd   :  { %1811 = vmatpush3.xpose.msra.mxu0 %v170_v29 }
   0xe   :  { %1802 = vmatmul.mubr.f32.vlgmr.msra.gmra.mrb[0].mxu1 %v139_v30  ;;  %1821 = vmatprep.subr.mxu0 %v2124_v0 }
   0xf   :  { %1804 = vmatprep.mubr.msk.f32.mxu1 %vm2125_vm1, %v2124_v0 }
  0x10   :  { %1813 = vmatmul.mubr.f32.vlgmr.msra.gmra.mrb[0].mxu0 %v2194_v10  ;;  %1196 = vperm.xlu0 %2122, %v39_v33  }
  0x11   :  { %1815 = vmatprep.mubr.msk.f32.mxu0 %vm2125_vm1, %v2124_v0  ;;  %1822 = vmatpush3.xpose.msra.mxu0 %v167_v14  ;;  %v704_v14 = vsub.f32 %v2291_v56, %v703_v4 }
  0x12   :  { %1832 = vmatprep.subr.mxu0 %v2124_v0  ;;  %1805 = vmatmul.mubr.f32.gmra.mrb[2].mxu1 %v149_v34 }
  0x13   :  { %1807 = vmatprep.mubr.msk.f32.mxu1 %vm2125_vm1, %v2124_v0  ;;  %v705_v25 = vand.u32 4294901760, %v704_v14 }
  0x14   :  { %1816 = vmatmul.mubr.f32.gmra.mrb[2].mxu0 %v2196_v12 }
  0x15   :  { %1818 = vmatprep.mubr.msk.f32.mxu0 %vm2125_vm1, %v2124_v0 }
  0x16   :  { %1808 = vmatmul.mubr.f32.gmra.mrb[4].mxu1 %v159_v36 }
  0x17   :  { %1871 = vmatprep.mubr.msk.f32.mxu1 %vm2125_vm1, %v2124_v0 }
  0x18   :  { %1819 = vmatmul.mubr.f32.gmra.mrb[4].mxu0 %v2212_v22 }
  0x19   :  { %1823 = vmatprep.mubr.msk.f32.mxu0 %vm2125_vm1, %v2124_v0 }
  0x1c   :  { %1824 = vmatmul.mubr.f32.vlgmr.msra.gmra.mrb[0].mxu0 %v136_v15  ;;  %v713_v15 = vand.u32 4294901760, %v2298_v5 }
  0x1d   :  { %1826 = vmatprep.mubr.msk.f32.mxu0 %vm2125_vm1, %v2124_v0  ;;  %1833 = vmatpush3.xpose.msra.mxu0 %v2192_v9 }
  0x1e   :  { %1843 = vmatprep.subr.mxu0 %v2124_v0  ;;  %v714_v26 = vsub.f32 %v2298_v5, %v713_v15 }
  0x20   :  { %1827 = vmatmul.mubr.f32.gmra.mrb[2].mxu0 %v146_v18  ;;  %v715_v34 = vand.u32 4294901760, %v714_v26 }
  0x21   :  { %1829 = vmatprep.mubr.msk.f32.mxu0 %vm2125_vm1, %v2124_v0 }
  0x24   :  { %1830 = vmatmul.mubr.f32.gmra.mrb[4].mxu0 %v156_v27  ;;  %v723_v27 = vand.u32 4294901760, %v2307_v16 }
  0x25   :  { %1834 = vmatprep.mubr.msk.f32.mxu0 %vm2125_vm1, %v2124_v0 }
  0x26   :  { %v724_v35 = vsub.f32 %v2307_v16, %v723_v27 }
  0x28   :  { %1835 = vmatmul.mubr.f32.vlgmr.msra.gmra.mrb[0].mxu0 %v137_v21 }
  0x29   :  { %1837 = vmatprep.mubr.msk.f32.mxu0 %vm2125_vm1, %v2124_v0  ;;  %1844 = vmatpush3.xpose.msra.mxu0 %v168_v20 }
  0x2a   :  { %1854 = vmatprep.subr.mxu0 %v2124_v0 }
  0x2c   :  { %1838 = vmatmul.mubr.f32.gmra.mrb[2].mxu0 %v147_v23 }
  0x2d   :  { %1840 = vmatprep.mubr.msk.f32.mxu0 %vm2125_vm1, %v2124_v0 }
  0x30   :  { %1841 = vmatmul.mubr.f32.gmra.mrb[4].mxu0 %v157_v31 }
  0x31   :  { %1845 = vmatprep.mubr.msk.f32.mxu0 %vm2125_vm1, %v2124_v0 }
  0x34   :  { %1846 = vmatmul.mubr.f32.vlgmr.msra.gmra.mrb[0].mxu0 %v2194_v10 }
  0x35   :  { %1848 = vmatprep.mubr.msk.f32.mxu0 %vm2125_vm1, %v2124_v0  ;;  %1855 = vmatpush3.xpose.msra.mxu0 %v2192_v9 }
  0x36   :  { %2030 = vmatprep.subr.bf16.mxu0 %v2127_v37 }
  0x38   :  { %1849 = vmatmul.mubr.f32.gmra.mrb[2].mxu0 %v2196_v12 }
  0x39   :  { %1851 = vmatprep.mubr.msk.f32.mxu0 %vm2125_vm1, %v2124_v0 }
  0x3c   :  { %1852 = vmatmul.mubr.f32.gmra.mrb[4].mxu0 %v2212_v22 }
  0x3d   :  { %1856 = vmatprep.mubr.msk.f32.mxu0 %vm2125_vm1, %v2124_v0 }
  0x40   :  { %1857 = vmatmul.mubr.f32.vlgmr.msra.gmra.mrb[0].mxu0 %v2194_v10 }
  0x41   :  { %1859 = vmatprep.mubr.msk.f32.mxu0 %vm2125_vm1, %v2124_v0 }
  0x44   :  { %1860 = vmatmul.mubr.f32.gmra.mrb[2].mxu0 %v2196_v12 }
  0x45   :  { %1862 = vmatprep.mubr.msk.f32.mxu0 %vm2125_vm1, %v2124_v0 }
  0x48   :  { %1863 = vmatmul.mubr.f32.gmra.mrb[4].mxu0 %v2212_v22 }
  0x49   :  { %1970 = vmatprep.mubr.msk.f32.mxu0 %vm2125_vm1, %v2124_v0 }
  0x83   :  { %v44_v46 = vpop.permute.xlu0 %43  ;;  %v54_v61 = vpop.permute.xlu1 %53 }
  0x87   :  { %v49_v55 = vpop.permute.xlu0 %48  ;;  %v607_v44 = vpop.permute.xlu1 %606 }
  0x8b   :  { %v612_v50 = vpop.permute.xlu0 %611 }
  0xe1   :  { %v141_v38 = vpop.f32.mrb[0].mxu1 }
  0xe2   :  { %v1803_v39 = vpop.f32.mrb[1].mxu1  ;;  %v142_v48 = vadd.f32 %v141_v38, %v44_v46 }
  0xe5   :  { %v151_v40 = vpop.f32.mrb[2].mxu1 }
  0xe6   :  { %v1806_v41 = vpop.f32.mrb[3].mxu1  ;;  %v152_v58 = vadd.f32 %v151_v40, %v49_v55  ;;  %v725_v40 = vand.u32 4294901760, %v724_v35 }
  0xe7   :  { %v38_v41 = vld [vmem:[%s2424_s5] sm:$0x3] }
  0xe9   :  { %v161_v42 = vpop.f32.mrb[4].mxu1 }
  0xea   :  { %v1809_v43 = vpop.f32.mrb[5].mxu1  ;;  %v162_v3 = vadd.f32 %v161_v42, %v54_v61  ;;  %v1200_v42 = vsel %vm619_vm2, %v38_v41, 0 }
  0xeb   :  { %v2390_v43 = vand.u32 4294901760, %v1200_v42 }
 0x113   :  { %v585_v51 = vpop.f32.mrb[0].mxu0 }
 0x114   :  { %v2046_v53 = vadd.f32 %v585_v51, %v142_v48  ;;  %v1858_v54 = vpop.f32.mrb[1].mxu0  ;;  %v1274_v48 = vsub.f32 %v1200_v42, %v2390_v43 }
 0x116   :  { %v601_v59 = vmax.f32 %v2046_v53, 0.0  ;;  %v1275_v55 = vand.u32 4294901760, %v1274_v48 }
 0x117   :  { %v591_v62 = vpop.f32.mrb[2].mxu0 }
 0x118   :  { %v634_v63 = vand.u32 4294901760, %v601_v59  ;;  %v2048_v1 = vadd.f32 %v591_v62, %v152_v58  ;;  %v1861_v2 = vpop.f32.mrb[3].mxu0  ;;  %v617_v58 = vpop.permute.xlu1 %616 }
 0x11a   :  { %v733_v7 = vsub.f32 %v601_v59, %v634_v63  ;;  %v602_v8 = vmax.f32 %v2048_v1, 0.0  ;;  %v1276_v1 = vsub.f32 %v1274_v48, %v1275_v55 }
 0x11b   :  { %v597_v9 = vpop.f32.mrb[4].mxu0 }
 0x11c   :  { %v734_v10 = vand.u32 4294901760, %v733_v7  ;;  %v637_v11 = vand.u32 4294901760, %v602_v8  ;;  %v2050_v12 = vadd.f32 %v597_v9, %v162_v3  ;;  %v1864_v13 = vpop.f32.mrb[5].mxu0 }
 0x11e   :  { %v2309_v17 = vpack.c.bf16 %v637_v11, %v634_v63  ;;  %v740_v18 = vsub.f32 %v602_v8, %v637_v11  ;;  %v603_v19 = vmax.f32 %v2050_v12, 0.0  ;;  %v735_v20 = vsub.f32 %v733_v7, %v734_v10 }
 0x120   :  { %v741_v21 = vand.u32 4294901760, %v740_v18  ;;  %v631_v22 = vsel %vm629_vm3, %v603_v19, 0  ;;  %2011 = vmatpush3.bf16.msra.mxu1 %v2309_v17  ;;  %v2016_v23 = vpack.c.bf16 %v740_v18, %v733_v7  ;;  %v736_v31 = vand.u32 4294901760, %v735_v20 }
 0x121   :  { %v2313_v24 = vand.u32 4294901760, %v631_v22  ;;  %1869 = vmatprep.subr.mxu1 %v2124_v0 }
 0x122   :  { %v742_v28 = vsub.f32 %v740_v18, %v741_v21  ;;  %v2022_v29 = vpack.c.bf16 %v741_v21, %v734_v10  ;;  %v1277_v10 = vand.u32 4294901760, %v1276_v1 }
 0x123   :  { %v747_v30 = vsub.f32 %v631_v22, %v2313_v24  ;;  %v1197_v22 = vpop.permute.xlu0 %1196 }
 0x124   :  { %v743_v32 = vand.u32 4294901760, %v742_v28  ;;  %1870 = vmatpush3.msra.mxu1 %v2313_v24 }
 0x125   :  { %v748_v33 = vand.u32 4294901760, %v747_v30  ;;  %1872 = vmatmul.mubr.f32.vlgmr.msra.gmra.mrb[6].mxu1 %v705_v25  ;;  %2012 = vmatprep.subr.bf16.mxu1 %v2127_v37 }
 0x126   :  { %1874 = vmatprep.mubr.msk.f32.mxu1 %vm2125_vm1, %v2124_v0  ;;  %v2013_v36 = vpack.c.bf16 %v743_v32, %v736_v31 }
 0x127   :  { %v749_v38 = vsub.f32 %v747_v30, %v748_v33 }
 0x128   :  { %2014 = vmatpush3.bf16.msra.mxu1 %v2013_v36 }
 0x129   :  { %1875 = vmatmul.mubr.f32.gmra.mrb[8].mxu1 %v715_v34  ;;  %1884 = vmatprep.subr.mxu1 %v2124_v0  ;;  %v750_v39 = vand.u32 4294901760, %v749_v38 }
 0x12a   :  { %1877 = vmatprep.mubr.msk.f32.mxu1 %vm2125_vm1, %v2124_v0 }
 0x12c   :  { %1885 = vmatpush3.msra.mxu1 %v750_v39 }
 0x12d   :  { %1878 = vmatmul.mubr.f32.gmra.mrb[10].mxu1 %v725_v40  ;;  %2015 = vmatprep.subr.bf16.mxu1 %v2127_v37 }
 0x12e   :  { %1886 = vmatprep.mubr.msk.f32.mxu1 %vm2125_vm1, %v2124_v0 }
 0x131   :  { %1887 = vmatmul.mubr.f32.vlgmr.msra.gmra.mrb[6].mxu1 %v2284_v49 }
 0x132   :  { %2017 = vmatpush3.bf16.msra.mxu1 %v2016_v23  ;;  %1889 = vmatprep.mubr.msk.f32.mxu1 %vm2125_vm1, %v2124_v0 }
 0x133   :  { %1899 = vmatprep.subr.mxu1 %v2124_v0 }
 0x135   :  { %1890 = vmatmul.mubr.f32.gmra.mrb[8].mxu1 %v2293_v57 }
 0x136   :  { %1900 = vmatpush3.msra.mxu1 %v747_v30  ;;  %1892 = vmatprep.mubr.msk.f32.mxu1 %vm2125_vm1, %v2124_v0 }
 0x137   :  { %2018 = vmatprep.subr.bf16.mxu1 %v2127_v37 }
 0x139   :  { %1893 = vmatmul.mubr.f32.gmra.mrb[10].mxu1 %v2300_v6 }
 0x13a   :  { %1901 = vmatprep.mubr.msk.f32.mxu1 %vm2125_vm1, %v2124_v0 }
 0x13d   :  { %1902 = vmatmul.mubr.f32.vlgmr.msra.gmra.mrb[6].mxu1 %v2291_v56 }
 0x13e   :  { %2020 = vmatpush3.bf16.msra.mxu1 %v2309_v17  ;;  %1904 = vmatprep.mubr.msk.f32.mxu1 %vm2125_vm1, %v2124_v0 }
 0x13f   :  { %1914 = vmatprep.subr.mxu1 %v2124_v0 }
 0x141   :  { %1905 = vmatmul.mubr.f32.gmra.mrb[8].mxu1 %v2298_v5 }
 0x142   :  { %1915 = vmatpush3.msra.mxu1 %v2313_v24  ;;  %1907 = vmatprep.mubr.msk.f32.mxu1 %vm2125_vm1, %v2124_v0 }
 0x143   :  { %2021 = vmatprep.subr.bf16.mxu1 %v2127_v37 }
 0x145   :  { %1908 = vmatmul.mubr.f32.gmra.mrb[10].mxu1 %v2307_v16 }
 0x146   :  { %1916 = vmatprep.mubr.msk.f32.mxu1 %vm2125_vm1, %v2124_v0 }
 0x149   :  { %1917 = vmatmul.mubr.f32.vlgmr.msra.gmra.mrb[6].mxu1 %v703_v4 }
 0x14a   :  { %2023 = vmatpush3.bf16.msra.mxu1 %v2022_v29  ;;  %1919 = vmatprep.mubr.msk.f32.mxu1 %vm2125_vm1, %v2124_v0 }
 0x14b   :  { %1929 = vmatprep.subr.mxu1 %v2124_v0 }
 0x14d   :  { %1920 = vmatmul.mubr.f32.gmra.mrb[8].mxu1 %v713_v15 }
 0x14e   :  { %1930 = vmatpush3.msra.mxu1 %v748_v33  ;;  %1922 = vmatprep.mubr.msk.f32.mxu1 %vm2125_vm1, %v2124_v0 }
 0x14f   :  { %2024 = vmatprep.subr.bf16.mxu1 %v2127_v37 }
 0x151   :  { %1923 = vmatmul.mubr.f32.gmra.mrb[10].mxu1 %v723_v27 }
 0x152   :  { %1931 = vmatprep.mubr.msk.f32.mxu1 %vm2125_vm1, %v2124_v0 }
 0x155   :  { %1932 = vmatmul.mubr.f32.vlgmr.msra.gmra.mrb[6].mxu1 %v2284_v49 }
 0x156   :  { %2026 = vmatpush3.bf16.msra.mxu1 %v2309_v17  ;;  %1934 = vmatprep.mubr.msk.f32.mxu1 %vm2125_vm1, %v2124_v0 }
 0x157   :  { %1944 = vmatprep.subr.mxu1 %v2124_v0 }
 0x159   :  { %1935 = vmatmul.mubr.f32.gmra.mrb[8].mxu1 %v2293_v57 }
 0x15a   :  { %1945 = vmatpush3.msra.mxu1 %v2313_v24  ;;  %1937 = vmatprep.mubr.msk.f32.mxu1 %vm2125_vm1, %v2124_v0 }
 0x15b   :  { %2027 = vmatprep.subr.bf16.mxu1 %v2127_v37 }
 0x15d   :  { %1938 = vmatmul.mubr.f32.gmra.mrb[10].mxu1 %v2300_v6 }
 0x15e   :  { %1946 = vmatprep.mubr.msk.f32.mxu1 %vm2125_vm1, %v2124_v0 }
 0x161   :  { %1947 = vmatmul.mubr.f32.vlgmr.msra.gmra.mrb[6].mxu1 %v2284_v49 }
 0x162   :  { %1949 = vmatprep.mubr.msk.f32.mxu1 %vm2125_vm1, %v2124_v0 }
 0x165   :  { %1950 = vmatmul.mubr.f32.gmra.mrb[8].mxu1 %v2293_v57 }
 0x166   :  { %1952 = vmatprep.mubr.msk.f32.mxu1 %vm2125_vm1, %v2124_v0 }
 0x169   :  { %1953 = vmatmul.mubr.f32.gmra.mrb[10].mxu1 %v2300_v6 }
 0x16a   :  { %1961 = vmatprep.mubr.msk.f32.mxu1 %vm2125_vm1, %v2124_v0 }
 0x234   :  { %v1175_v45 = vpop.f32.mrb[6].mxu1 }
 0x235   :  { %v2051_v46 = vadd.f32 %v1175_v45, %v607_v44  ;;  %v1948_v47 = vpop.f32.mrb[7].mxu1 }
 0x237   :  { %v1191_v49 = vmax.f32 %v2051_v46, 0.0 }
 0x238   :  { %v1181_v51 = vpop.f32.mrb[8].mxu1 }
 0x239   :  { %v1206_v52 = vand.u32 4294901760, %v1191_v49  ;;  %v2052_v53 = vadd.f32 %v1181_v51, %v612_v50  ;;  %v1951_v54 = vpop.f32.mrb[9].mxu1 }
 0x23b   :  { %v1285_v56 = vsub.f32 %v1191_v49, %v1206_v52  ;;  %v1192_v57 = vmax.f32 %v2052_v53, 0.0 }
 0x23c   :  { %v1187_v59 = vpop.f32.mrb[10].mxu1 }
 0x23d   :  { %v1286_v60 = vand.u32 4294901760, %v1285_v56  ;;  %v1209_v61 = vand.u32 4294901760, %v1192_v57  ;;  %v2053_v62 = vadd.f32 %v1187_v59, %v617_v58  ;;  %v1954_v63 = vpop.f32.mrb[11].mxu1 }
 0x23f   :  { %v2028_v2 = vpack.c.bf16 %v1209_v61, %v1206_v52  ;;  %v1292_v3 = vsub.f32 %v1192_v57, %v1209_v61  ;;  %v1193_v4 = vmax.f32 %v2053_v62, 0.0  ;;  %v1287_v5 = vsub.f32 %v1285_v56, %v1286_v60 }
 0x241   :  { %v1293_v6 = vand.u32 4294901760, %v1292_v3  ;;  %v1203_v7 = vsel %vm629_vm3, %v1193_v4, 0  ;;  %2029 = vmatpush3.bf16.msra.mxu1 %v2028_v2  ;;  %v2034_v8 = vpack.c.bf16 %v1292_v3, %v1285_v56  ;;  %v1288_v14 = vand.u32 4294901760, %v1287_v5 }
 0x242   :  { %v1212_v9 = vand.u32 4294901760, %v1203_v7  ;;  %1959 = vmatprep.subr.mxu1 %v2124_v0 }
 0x243   :  { %v1294_v11 = vsub.f32 %v1292_v3, %v1293_v6  ;;  %v2040_v12 = vpack.c.bf16 %v1293_v6, %v1286_v60 }
 0x244   :  { %v1299_v13 = vsub.f32 %v1203_v7, %v1212_v9 }
 0x245   :  { %v1295_v15 = vand.u32 4294901760, %v1294_v11  ;;  %1960 = vmatpush3.msra.mxu1 %v1212_v9 }
 0x246   :  { %v1300_v16 = vand.u32 4294901760, %v1299_v13  ;;  %1962 = vmatmul.mubr.f32.vlgmr.msra.gmra.mrb[12].mxu1 %v1277_v10 }
 0x247   :  { %v2031_v17 = vpack.c.bf16 %v1295_v15, %v1288_v14 }
 0x248   :  { %v1301_v18 = vsub.f32 %v1299_v13, %v1300_v16 }
 0x249   :  { %2032 = vmatpush3.bf16.msra.mxu0 %v2031_v17 }
 0x24a   :  { %1968 = vmatprep.subr.mxu0 %v2124_v0  ;;  %v1302_v19 = vand.u32 4294901760, %v1301_v18 }
 0x24d   :  { %1969 = vmatpush3.msra.mxu0 %v1302_v19 }
 0x24e   :  { %1971 = vmatmul.mubr.f32.vlgmr.msra.gmra.mrb[6].mxu0 %v2390_v43  ;;  %2033 = vmatprep.subr.bf16.mxu0 %v2127_v37 }
 0x24f   :  { %2035 = vmatpush3.bf16.msra.mxu0 %v2034_v8  ;;  %1979 = vmatprep.mubr.msk.f32.mxu0 %vm2125_vm1, %v2124_v0 }
 0x250   :  { %1977 = vmatprep.subr.mxu0 %v2124_v0 }
 0x253   :  { %1978 = vmatpush3.msra.mxu0 %v1299_v13 }
 0x254   :  { %2036 = vmatprep.subr.bf16.mxu0 %v2127_v37 }
 0x256   :  { %1980 = vmatmul.mubr.f32.vlgmr.msra.gmra.mrb[6].mxu0 %v1274_v48 }
 0x257   :  { %2038 = vmatpush3.bf16.msra.mxu0 %v2028_v2  ;;  %1988 = vmatprep.mubr.msk.f32.mxu0 %vm2125_vm1, %v2124_v0 }
 0x258   :  { %1986 = vmatprep.subr.mxu0 %v2124_v0 }
 0x25b   :  { %1987 = vmatpush3.msra.mxu0 %v1212_v9 }
 0x25c   :  { %2039 = vmatprep.subr.bf16.mxu0 %v2127_v37 }
 0x25e   :  { %1989 = vmatmul.mubr.f32.vlgmr.msra.gmra.mrb[6].mxu0 %v1275_v55 }
 0x25f   :  { %2041 = vmatpush3.bf16.msra.mxu0 %v2040_v12  ;;  %1997 = vmatprep.mubr.msk.f32.mxu0 %vm2125_vm1, %v2124_v0 }
 0x260   :  { %1995 = vmatprep.subr.mxu0 %v2124_v0 }
 0x263   :  { %1996 = vmatpush3.msra.mxu0 %v1300_v16 }
 0x264   :  { %2042 = vmatprep.subr.bf16.mxu0 %v2127_v37 }
 0x266   :  { %1998 = vmatmul.mubr.f32.vlgmr.msra.gmra.mrb[6].mxu0 %v2390_v43 }
 0x267   :  { %2044 = vmatpush3.bf16.msra.mxu0 %v2028_v2  ;;  %2006 = vmatprep.mubr.msk.f32.mxu0 %vm2125_vm1, %v2124_v0 }
 0x268   :  { %2004 = vmatprep.subr.mxu0 %v2124_v0 }
 0x26b   :  { %2005 = vmatpush3.msra.mxu0 %v1212_v9 }
 0x26e   :  { %2007 = vmatmul.mubr.f32.vlgmr.msra.gmra.mrb[6].mxu0 %v2390_v43 }
 0x319   :  { %v1279_v20 = vpop.f32.mrb[12].mxu1 }
 0x31a   :  { %v1963_v21 = vpop.f32.mrb[13].mxu1  ;;  %v1280_v23 = vadd.f32 %v1279_v20, %v1197_v22 }
 0x341   :  { %v1673_v24 = vpop.f32.mrb[6].mxu0 }
 0x342   :  { %v2055_v25 = vadd.f32 %v1673_v24, %v1280_v23  ;;  %v2008_v26 = vpop.f32.mrb[7].mxu0 }
 0x344   :  { %1677 = vxpose.xlu1.b32.start.end [1/1] (short) (narrow) %v2055_v25, 8 }
 0x3c4   :  { %v1693_v37 = vpop.trf.xlu1 }
 0x3c5   :  { %1710 = vst.msk [vmem:[%s2425_s7] sm:$0xff] %vm1709_vm4, %v1693_v37 }

</bundles_post_ra>
